<compile_context>
chip_gen: v6e
topology: v6e:2x2x1
jax: 0.10.0
libtpu: 0.0.40
codegen_flags: <defaults>
</compile_context>

<pallas_src>
import jax
import jax.numpy as jnp
from jax.experimental import pallas as pl
from jax.experimental.pallas import tpu as pltpu


# -----------------------------------------------------------------------------
# Fused Pallas kernel
# -----------------------------------------------------------------------------
def _make_fused_kernel(n_branch, height, width, b_tile, ew_dtype):
    hw = height * width
    lanes = b_tile * hw           # batch images flattened onto the lane axis

    def kernel(*refs):
        # refs = [x, (w3f, sh1, w1f, sh2) * n_branch, wof, sho, out1, out2]
        x_ref = refs[0]
        out1_ref, out2_ref = refs[-2], refs[-1]
        pr = refs[1:-2]

        # --- 3x3 border masks, built once per grid step from a lane iota ---
        # (bitwise ops only; H, W are powers of two so no vector div/rem).
        lane = jax.lax.broadcasted_iota(jnp.int32, (1, lanes), 1)
        p_img = jnp.bitwise_and(lane, hw - 1)        # position within image
        w_img = jnp.bitwise_and(lane, width - 1)     # column within image
        cond_h = {-1: p_img >= width, 0: None, 1: p_img < hw - width}
        cond_w = {-1: w_img >= 1,     0: None, 1: w_img < width - 1}

        def tap_mask(dy, dx):
            cs = [c for c in (cond_h[dy], cond_w[dx]) if c is not None]
            if not cs:
                return None
            m = cs[0]
            for c in cs[1:]:
                m = jnp.logical_and(m, c)
            return m

        masks = [tap_mask(dy, dx) for dy in (-1, 0, 1) for dx in (-1, 0, 1)]

        cur = x_ref[0].astype(ew_dtype)              # (C_in, lanes) lane-dense
        y1 = None
        acc = None
        for b in range(n_branch):                     # branches unrolled
            w3f, sh1, w1f, sh2 = pr[4 * b:4 * b + 4]
            cb = w3f.shape[1] // 9                    # channels conv1 expects
            if cur.shape[0] < cb:                     # only if fold padded C_in
                cur = jnp.concatenate(
                    [cur, jnp.zeros((cb - cur.shape[0], lanes), cur.dtype)],
                    axis=0)

            # Nine 3x3 taps: static lane rotations (XLU) + border select (VPU).
            # Cross-image / wrap-around lanes only appear at masked positions.
            taps = []
            t = 0
            for dy in (-1, 0, 1):
                for dx in (-1, 0, 1):
                    k = dy * width + dx               # flattened tap offset
                    if k == 0:
                        v = cur
                    else:
                        v = pltpu.roll(cur, shift=(-k) % lanes, axis=1)
                    if masks[t] is not None:
                        v = jnp.where(masks[t], v, jnp.zeros((), ew_dtype))
                    taps.append(v)
                    t += 1
            # im2col patch: one K = 9*cb MXU matmul instead of 9 tiny ones.
            patch = jnp.concatenate(taps, axis=0).astype(jnp.bfloat16)

            # conv1 (3x3) + folded bias/BN + ReLU      -> (Oc1, lanes) f32
            y1 = jnp.dot(w3f[...], patch, preferred_element_type=jnp.float32)
            y1 = jnp.maximum(y1 + sh1[...], 0.0)

            # conv2 (1x1) + folded bias/BN             -> (Ct, lanes) f32
            y2 = jnp.dot(w1f[...], y1.astype(jnp.bfloat16),
                         preferred_element_type=jnp.float32) + sh2[...]

            acc = y2 if acc is None else acc + y2
            cur = y1.astype(ew_dtype)

        # out_conv: ReLU -> 1x1 conv + folded bias/BN  -> (Oc2, lanes)
        wof, sho = pr[4 * n_branch], pr[4 * n_branch + 1]
        z = jnp.maximum(acc, 0.0).astype(jnp.bfloat16)
        out2 = jnp.dot(wof[...], z, preferred_element_type=jnp.float32) + sho[...]

        out1_ref[0] = y1.astype(out1_ref.dtype)       # full-lane unmasked stores
        out2_ref[0] = out2.astype(out2_ref.dtype)

    return kernel


# -----------------------------------------------------------------------------
# Wrapper around pallas_call
# -----------------------------------------------------------------------------
def _const_spec(shape):
    # Constant operands (weights / shifts): block index is always (0,...,0).
    # TODO(synk): pipeline_mode=pl.Buffered(1) would drop their double buffer;
    # negligible at these sizes so left at the default.
    return pl.BlockSpec(shape, lambda i, _n=len(shape): (0,) * _n)


def nonlinear_rcfnet_block(x_nchw, branch_folded, out_folded, *,
                           num_grid_steps=None, max_batch_tile=8,
                           elementwise_bf16=False, out_dtype=jnp.float32):
    """Fused forward pass.  Input in NCHW f32, outputs NCHW `out_dtype`.

    elementwise_bf16: do the tap rolls / border masking in bf16 (worthwhile on
    v6e/v7x which have a native bf16 VPU; keep False on v5e).  MXU operands
    are bf16 with f32 accumulate either way.
    """
    n, cin, height, width = x_nchw.shape
    if (height & (height - 1)) or (width & (width - 1)):
        # TODO(synk): non-power-of-two H/W needs host-built border masks (or
        # vector int div/rem for the in-kernel iota); not needed here.
        raise NotImplementedError("height and width must be powers of two")
    hw = height * width
    n_branch = len(branch_folded)
    oc1 = branch_folded[-1]["w3f"].shape[0]
    oc2 = out_folded["wof"].shape[0]

    # Input-channel count the (zero-padded) branch-0 weights expect.
    c0 = branch_folded[0]["w3f"].shape[1] // 9
    assert c0 >= cin, "folded branch-0 weights expect fewer channels than x"

    # Grid: >=2 parallel steps when N>=2 (feeds both v7x TensorCores), batch
    # tile capped so the lane axis stays a modest multiple of 128.
    if num_grid_steps is None:
        num_grid_steps = max(min(n, 2), -(-n // max_batch_tile))
    b_tile = -(-n // num_grid_steps)
    n_pad = num_grid_steps * b_tile
    lanes = b_tile * hw

    # NCHW -> (steps, C, B_tile*H*W): flatten batch onto the lane axis.
    # Wrapper-side layout plumbing only; padded channels / images are zeros.
    x = x_nchw.reshape(n, cin, hw)
    x = jnp.pad(x, ((0, n_pad - n), (0, c0 - cin), (0, 0)))
    x = x.reshape(num_grid_steps, b_tile, c0, hw).transpose(0, 2, 1, 3)
    x = x.reshape(num_grid_steps, c0, lanes)

    args = [x]
    in_specs = [pl.BlockSpec((1, c0, lanes), lambda i: (i, 0, 0))]
    for p in branch_folded:
        for name in ("w3f", "sh1", "w1f", "sh2"):
            a = p[name]
            args.append(a)
            in_specs.append(_const_spec(a.shape))
    for name in ("wof", "sho"):
        a = out_folded[name]
        args.append(a)
        in_specs.append(_const_spec(a.shape))

    ew_dtype = jnp.bfloat16 if elementwise_bf16 else jnp.float32
    out1_flat, out2_flat = pl.pallas_call(
        _make_fused_kernel(n_branch, height, width, b_tile, ew_dtype),
        grid=(num_grid_steps,),
        in_specs=in_specs,
        out_specs=(pl.BlockSpec((1, oc1, lanes), lambda i: (i, 0, 0)),
                   pl.BlockSpec((1, oc2, lanes), lambda i: (i, 0, 0))),
        out_shape=(jax.ShapeDtypeStruct((num_grid_steps, oc1, lanes), out_dtype),
                   jax.ShapeDtypeStruct((num_grid_steps, oc2, lanes), out_dtype)),
        compiler_params=pltpu.CompilerParams(
            dimension_semantics=("parallel",)),
    )(*args)

    def unflatten(o, c):
        o = o.reshape(num_grid_steps, c, b_tile, hw).transpose(0, 2, 1, 3)
        return o.reshape(n_pad, c, height, width)[:n]

    return unflatten(out1_flat, oc1), unflatten(out2_flat, oc2)


# -----------------------------------------------------------------------------
# Parameter construction and folding (bias + BN(eval) folded into weights)
# -----------------------------------------------------------------------------
def _make_bn(key, c, eps=1e-5):
    k1, k2, k3, k4 = jax.random.split(key, 4)
    gamma = 1.0 + 0.1 * jax.random.normal(k1, (c,), jnp.float32)
    beta = 0.1 * jax.random.normal(k2, (c,), jnp.float32)
    mean = 0.1 * jax.random.normal(k3, (c,), jnp.float32)
    var = jnp.abs(1.0 + 0.1 * jax.random.normal(k4, (c,), jnp.float32))
    scale = gamma / jnp.sqrt(var + eps)
    shift = beta - mean * scale
    return scale.reshape(1, c), shift.reshape(1, c)


def make_double_conv_params(key, cin, oc1, oc2):
    ks = jax.random.split(key, 6)
    s1, t1 = _make_bn(ks[2], oc1)
    s2, t2 = _make_bn(ks[5], oc2)
    return dict(
        w3=0.1 * jax.random.normal(ks[0], (3, 3, cin, oc1), jnp.float32),
        b3=0.1 * jax.random.normal(ks[1], (1, oc1), jnp.float32),
        s1=s1, t1=t1,
        w1=0.1 * jax.random.normal(ks[3], (oc1, oc2), jnp.float32),
        b1=0.1 * jax.random.normal(ks[4], (1, oc2), jnp.float32),
        s2=s2, t2=t2,
    )


def make_out_conv_params(key, ct, oc):
    ks = jax.random.split(key, 3)
    s, t = _make_bn(ks[2], oc)
    return dict(
        w=0.1 * jax.random.normal(ks[0], (ct, oc), jnp.float32),
        b=0.1 * jax.random.normal(ks[1], (1, oc), jnp.float32),
        s=s, t=t,
    )


def fold_double_conv_params(p, sublane=8):
    """Fold conv bias + BN(eval) into weights, bf16 weights, (C_out, K) layout.

    Input channels are zero-padded to a multiple of `sublane` so the in-kernel
    im2col concat stays tile-aligned (use sublane=16 with elementwise_bf16).
    """
    kh, kw, cin, oc1 = p["w3"].shape
    ct = p["w1"].shape[1]
    cpad = ((cin + sublane - 1) // sublane) * sublane
    w3 = p["w3"]
    if cpad != cin:
        w3 = jnp.pad(w3, ((0, 0), (0, 0), (0, cpad - cin), (0, 0)))
    s1 = p["s1"].reshape(oc1)
    t1 = p["t1"].reshape(oc1)
    s2 = p["s2"].reshape(ct)
    t2 = p["t2"].reshape(ct)
    w3f = (w3.reshape(kh * kw * cpad, oc1).T * s1[:, None]).astype(jnp.bfloat16)
    sh1 = (p["b3"].reshape(oc1) * s1 + t1).reshape(oc1, 1).astype(jnp.float32)
    w1f = (p["w1"].T * s2[:, None]).astype(jnp.bfloat16)
    sh2 = (p["b1"].reshape(ct) * s2 + t2).reshape(ct, 1).astype(jnp.float32)
    return dict(w3f=w3f, sh1=sh1, w1f=w1f, sh2=sh2)


def fold_out_conv_params(p):
    ct, oc2 = p["w"].shape
    s = p["s"].reshape(oc2)
    t = p["t"].reshape(oc2)
    wof = (p["w"].T * s[:, None]).astype(jnp.bfloat16)
    sho = (p["b"].reshape(oc2) * s + t).reshape(oc2, 1).astype(jnp.float32)
    return dict(wof=wof, sho=sho)


# -----------------------------------------------------------------------------
# Pure-JAX f32 reference (unfolded parameters) for correctness check
# -----------------------------------------------------------------------------
def _ref_double_conv(x, p):
    y = jax.lax.conv_general_dilated(
        x, p["w3"], window_strides=(1, 1), padding="SAME",
        dimension_numbers=("NHWC", "HWIO", "NHWC"))
    y = (y + p["b3"].reshape(1, 1, 1, -1)) * p["s1"].reshape(1, 1, 1, -1) \
        + p["t1"].reshape(1, 1, 1, -1)
    out1 = jnp.maximum(y, 0.0)
    y2 = jnp.einsum("nhwc,cd->nhwd", out1, p["w1"]) + p["b1"].reshape(1, 1, 1, -1)
    out2 = y2 * p["s2"].reshape(1, 1, 1, -1) + p["t2"].reshape(1, 1, 1, -1)
    return out1, out2


def ref_block(x_nchw, branch_params, out_params):
    x = jnp.transpose(x_nchw, (0, 2, 3, 1))
    t1 = x
    acc = None
    for p in branch_params:
        t1, t2 = _ref_double_conv(t1, p)
        acc = t2 if acc is None else acc + t2
    y = jnp.maximum(acc, 0.0)
    y = jnp.einsum("nhwc,cd->nhwd", y, out_params["w"]) \
        + out_params["b"].reshape(1, 1, 1, -1)
    y = y * out_params["s"].reshape(1, 1, 1, -1) + out_params["t"].reshape(1, 1, 1, -1)
    return jnp.transpose(t1, (0, 3, 1, 2)), jnp.transpose(y, (0, 3, 1, 2))


# -----------------------------------------------------------------------------
if __name__ == "__main__":
    key = jax.random.PRNGKey(0)
    # Module hyper-params (small, consistent with the forward):
    in_channel, out_channel1, channel_t, out_channel2, n_branch = 4, 8, 8, 4, 3
    N, H, W = 2, 16, 16

    k_x, k_p = jax.random.split(key)
    x_nchw = jax.random.normal(k_x, (N, in_channel, H, W), jnp.float32)

    bkeys = jax.random.split(k_p, n_branch + 1)
    branch_params = [make_double_conv_params(bkeys[0], in_channel,
                                             out_channel1, channel_t)]
    for i in range(1, n_branch):
        branch_params.append(make_double_conv_params(bkeys[i], out_channel1,
                                                     out_channel1, channel_t))
    out_params = make_out_conv_params(bkeys[n_branch], channel_t, out_channel2)

    # One-time parameter prep: fold bias + BN(eval) into bf16 weights.
    branch_folded = [fold_double_conv_params(p) for p in branch_params]
    out_folded = fold_out_conv_params(out_params)

    fwd = jax.jit(nonlinear_rcfnet_block)
    out1, out2 = fwd(x_nchw, branch_folded, out_folded)
    jax.block_until_ready((out1, out2))

    ref1, ref2 = ref_block(x_nchw, branch_params, out_params)
    assert out1.shape == (N, out_channel1, H, W)
    assert out2.shape == (N, out_channel2, H, W)
    # Tolerance sized for bf16 MXU operands (f32 accumulate) across a 3-branch
    # chain vs. the pure f32 reference; real layout/indexing bugs are O(1).
    assert jnp.allclose(out1, ref1, atol=5e-2, rtol=5e-2)
    assert jnp.allclose(out2, ref2, atol=5e-2, rtol=5e-2)

    print("KERNEL_OK")
</pallas_src>

<mosaic_0001>
module attributes {stable_mosaic.version = 11 : i64} {
  func.func @kernel(%arg0: i32, %arg1: memref<1x8x256xf32, #tpu.memory_space<vmem>>, %arg2: memref<8x72xbf16, #tpu.memory_space<vmem>>, %arg3: memref<8x1xf32, #tpu.memory_space<vmem>>, %arg4: memref<8x8xbf16, #tpu.memory_space<vmem>>, %arg5: memref<8x1xf32, #tpu.memory_space<vmem>>, %arg6: memref<8x72xbf16, #tpu.memory_space<vmem>>, %arg7: memref<8x1xf32, #tpu.memory_space<vmem>>, %arg8: memref<8x8xbf16, #tpu.memory_space<vmem>>, %arg9: memref<8x1xf32, #tpu.memory_space<vmem>>, %arg10: memref<8x72xbf16, #tpu.memory_space<vmem>>, %arg11: memref<8x1xf32, #tpu.memory_space<vmem>>, %arg12: memref<8x8xbf16, #tpu.memory_space<vmem>>, %arg13: memref<8x1xf32, #tpu.memory_space<vmem>>, %arg14: memref<4x8xbf16, #tpu.memory_space<vmem>>, %arg15: memref<4x1xf32, #tpu.memory_space<vmem>>, %arg16: memref<1x8x256xf32, #tpu.memory_space<vmem>>, %arg17: memref<1x4x256xf32, #tpu.memory_space<vmem>>) attributes {dimension_semantics = [#tpu.dimension_semantics<parallel>], iteration_bounds = array<i64: 2>, scalar_prefetch = 0 : i64, scratch_operands = 0 : i64, tpu.core_type = #tpu.core_type<tc>, window_params = [{transform_indices = @transform_0, window_bounds = array<i64: 1, 8, 256>}, {pipeline_mode = #tpu.pipeline_mode<synchronous>, transform_indices = @transform_1, window_bounds = array<i64: 8, 72>}, {pipeline_mode = #tpu.pipeline_mode<synchronous>, transform_indices = @transform_2, window_bounds = array<i64: 8, 1>}, {pipeline_mode = #tpu.pipeline_mode<synchronous>, transform_indices = @transform_3, window_bounds = array<i64: 8, 8>}, {pipeline_mode = #tpu.pipeline_mode<synchronous>, transform_indices = @transform_4, window_bounds = array<i64: 8, 1>}, {pipeline_mode = #tpu.pipeline_mode<synchronous>, transform_indices = @transform_5, window_bounds = array<i64: 8, 72>}, {pipeline_mode = #tpu.pipeline_mode<synchronous>, transform_indices = @transform_6, window_bounds = array<i64: 8, 1>}, {pipeline_mode = #tpu.pipeline_mode<synchronous>, transform_indices = @transform_7, window_bounds = array<i64: 8, 8>}, {pipeline_mode = #tpu.pipeline_mode<synchronous>, transform_indices = @transform_8, window_bounds = array<i64: 8, 1>}, {pipeline_mode = #tpu.pipeline_mode<synchronous>, transform_indices = @transform_9, window_bounds = array<i64: 8, 72>}, {pipeline_mode = #tpu.pipeline_mode<synchronous>, transform_indices = @transform_10, window_bounds = array<i64: 8, 1>}, {pipeline_mode = #tpu.pipeline_mode<synchronous>, transform_indices = @transform_11, window_bounds = array<i64: 8, 8>}, {pipeline_mode = #tpu.pipeline_mode<synchronous>, transform_indices = @transform_12, window_bounds = array<i64: 8, 1>}, {pipeline_mode = #tpu.pipeline_mode<synchronous>, transform_indices = @transform_13, window_bounds = array<i64: 4, 8>}, {pipeline_mode = #tpu.pipeline_mode<synchronous>, transform_indices = @transform_14, window_bounds = array<i64: 4, 1>}, {transform_indices = @transform_15, window_bounds = array<i64: 1, 8, 256>}, {transform_indices = @transform_16, window_bounds = array<i64: 1, 4, 256>}]} {
    %0 = tpu.iota {dimensions = array<i32: 1>} : vector<1x256xi32>
    %c255_i32 = arith.constant 255 : i32
    %1 = vector.broadcast %c255_i32 : i32 to vector<1x256xi32>
    %2 = arith.andi %0, %1 : vector<1x256xi32>
    %c15_i32 = arith.constant 15 : i32
    %3 = vector.broadcast %c15_i32 : i32 to vector<1x256xi32>
    %4 = arith.andi %0, %3 : vector<1x256xi32>
    %c16_i32 = arith.constant 16 : i32
    %5 = vector.broadcast %c16_i32 : i32 to vector<1x256xi32>
    %6 = arith.cmpi sge, %2, %5 : vector<1x256xi32>
    %c240_i32 = arith.constant 240 : i32
    %7 = vector.broadcast %c240_i32 : i32 to vector<1x256xi32>
    %8 = arith.cmpi slt, %2, %7 : vector<1x256xi32>
    %c1_i32 = arith.constant 1 : i32
    %9 = vector.broadcast %c1_i32 : i32 to vector<1x256xi32>
    %10 = arith.cmpi sge, %4, %9 : vector<1x256xi32>
    %c15_i32_0 = arith.constant 15 : i32
    %11 = vector.broadcast %c15_i32_0 : i32 to vector<1x256xi32>
    %12 = arith.cmpi slt, %4, %11 : vector<1x256xi32>
    %13 = arith.andi %6, %10 : vector<1x256xi1>
    %14 = arith.andi %6, %12 : vector<1x256xi1>
    %15 = arith.andi %8, %10 : vector<1x256xi1>
    %16 = arith.andi %8, %12 : vector<1x256xi1>
    %c0 = arith.constant 0 : index
    %c0_1 = arith.constant 0 : index
    %c0_2 = arith.constant 0 : index
    %17 = vector.load %arg1[%c0, %c0_1, %c0_2] : memref<1x8x256xf32, #tpu.memory_space<vmem>>, vector<1x8x256xf32>
    %18 = vector.shape_cast %17 : vector<1x8x256xf32> to vector<8x256xf32>
    %c17_i32 = arith.constant 17 : i32
    %19 = tpu.dynamic_rotate %18 by %c17_i32 dim 1 : vector<8x256xf32>, i32 -> vector<8x256xf32>
    %cst = arith.constant 0.000000e+00 : f32
    %20 = vector.shape_cast %13 : vector<1x256xi1> to vector<1x256xi1>
    %21 = vector.broadcast %20 : vector<1x256xi1> to vector<8x256xi1>
    %22 = vector.broadcast %cst : f32 to vector<8x256xf32>
    %23 = arith.select %21, %19, %22 : vector<8x256xi1>, vector<8x256xf32>
    %c16_i32_3 = arith.constant 16 : i32
    %24 = tpu.dynamic_rotate %18 by %c16_i32_3 dim 1 : vector<8x256xf32>, i32 -> vector<8x256xf32>
    %cst_4 = arith.constant 0.000000e+00 : f32
    %25 = vector.shape_cast %6 : vector<1x256xi1> to vector<1x256xi1>
    %26 = vector.broadcast %25 : vector<1x256xi1> to vector<8x256xi1>
    %27 = vector.broadcast %cst_4 : f32 to vector<8x256xf32>
    %28 = arith.select %26, %24, %27 : vector<8x256xi1>, vector<8x256xf32>
    %c15_i32_5 = arith.constant 15 : i32
    %29 = tpu.dynamic_rotate %18 by %c15_i32_5 dim 1 : vector<8x256xf32>, i32 -> vector<8x256xf32>
    %cst_6 = arith.constant 0.000000e+00 : f32
    %30 = vector.shape_cast %14 : vector<1x256xi1> to vector<1x256xi1>
    %31 = vector.broadcast %30 : vector<1x256xi1> to vector<8x256xi1>
    %32 = vector.broadcast %cst_6 : f32 to vector<8x256xf32>
    %33 = arith.select %31, %29, %32 : vector<8x256xi1>, vector<8x256xf32>
    %c1_i32_7 = arith.constant 1 : i32
    %34 = tpu.dynamic_rotate %18 by %c1_i32_7 dim 1 : vector<8x256xf32>, i32 -> vector<8x256xf32>
    %cst_8 = arith.constant 0.000000e+00 : f32
    %35 = vector.shape_cast %10 : vector<1x256xi1> to vector<1x256xi1>
    %36 = vector.broadcast %35 : vector<1x256xi1> to vector<8x256xi1>
    %37 = vector.broadcast %cst_8 : f32 to vector<8x256xf32>
    %38 = arith.select %36, %34, %37 : vector<8x256xi1>, vector<8x256xf32>
    %c255_i32_9 = arith.constant 255 : i32
    %39 = tpu.dynamic_rotate %18 by %c255_i32_9 dim 1 : vector<8x256xf32>, i32 -> vector<8x256xf32>
    %cst_10 = arith.constant 0.000000e+00 : f32
    %40 = vector.shape_cast %12 : vector<1x256xi1> to vector<1x256xi1>
    %41 = vector.broadcast %40 : vector<1x256xi1> to vector<8x256xi1>
    %42 = vector.broadcast %cst_10 : f32 to vector<8x256xf32>
    %43 = arith.select %41, %39, %42 : vector<8x256xi1>, vector<8x256xf32>
    %c241_i32 = arith.constant 241 : i32
    %44 = tpu.dynamic_rotate %18 by %c241_i32 dim 1 : vector<8x256xf32>, i32 -> vector<8x256xf32>
    %cst_11 = arith.constant 0.000000e+00 : f32
    %45 = vector.shape_cast %15 : vector<1x256xi1> to vector<1x256xi1>
    %46 = vector.broadcast %45 : vector<1x256xi1> to vector<8x256xi1>
    %47 = vector.broadcast %cst_11 : f32 to vector<8x256xf32>
    %48 = arith.select %46, %44, %47 : vector<8x256xi1>, vector<8x256xf32>
    %c240_i32_12 = arith.constant 240 : i32
    %49 = tpu.dynamic_rotate %18 by %c240_i32_12 dim 1 : vector<8x256xf32>, i32 -> vector<8x256xf32>
    %cst_13 = arith.constant 0.000000e+00 : f32
    %50 = vector.shape_cast %8 : vector<1x256xi1> to vector<1x256xi1>
    %51 = vector.broadcast %50 : vector<1x256xi1> to vector<8x256xi1>
    %52 = vector.broadcast %cst_13 : f32 to vector<8x256xf32>
    %53 = arith.select %51, %49, %52 : vector<8x256xi1>, vector<8x256xf32>
    %c239_i32 = arith.constant 239 : i32
    %54 = tpu.dynamic_rotate %18 by %c239_i32 dim 1 : vector<8x256xf32>, i32 -> vector<8x256xf32>
    %cst_14 = arith.constant 0.000000e+00 : f32
    %55 = vector.shape_cast %16 : vector<1x256xi1> to vector<1x256xi1>
    %56 = vector.broadcast %55 : vector<1x256xi1> to vector<8x256xi1>
    %57 = vector.broadcast %cst_14 : f32 to vector<8x256xf32>
    %58 = arith.select %56, %54, %57 : vector<8x256xi1>, vector<8x256xf32>
    %59 = tpu.concatenate %23, %28, %33, %38, %18, %43, %48, %53, %58 in 0 : vector<8x256xf32>, vector<8x256xf32>, vector<8x256xf32>, vector<8x256xf32>, vector<8x256xf32>, vector<8x256xf32>, vector<8x256xf32>, vector<8x256xf32>, vector<8x256xf32> -> vector<72x256xf32>
    %60 = arith.truncf %59 : vector<72x256xf32> to vector<72x256xbf16>
    %c0_15 = arith.constant 0 : index
    %c0_16 = arith.constant 0 : index
    %61 = vector.load %arg2[%c0_15, %c0_16] : memref<8x72xbf16, #tpu.memory_space<vmem>>, vector<8x72xbf16>
    %cst_17 = arith.constant dense<0.000000e+00> : vector<8x256xf32>
    %62 = tpu.matmul %61, %60, %cst_17 {dimension_numbers = #tpu.dot_dimension_numbers<[1], [0], [0], [1], [0, 0, 1, 1], [], []>} : vector<8x72xbf16>, vector<72x256xbf16>, vector<8x256xf32> -> vector<8x256xf32>
    %c0_18 = arith.constant 0 : index
    %c0_19 = arith.constant 0 : index
    %63 = vector.load %arg3[%c0_18, %c0_19] : memref<8x1xf32, #tpu.memory_space<vmem>>, vector<8x1xf32>
    %64 = vector.broadcast %63 : vector<8x1xf32> to vector<8x256xf32>
    %65 = arith.addf %62, %64 : vector<8x256xf32>
    %cst_20 = arith.constant 0.000000e+00 : f32
    %66 = vector.broadcast %cst_20 : f32 to vector<8x256xf32>
    %67 = arith.maximumf %65, %66 : vector<8x256xf32>
    %c0_21 = arith.constant 0 : index
    %c0_22 = arith.constant 0 : index
    %68 = vector.load %arg4[%c0_21, %c0_22] : memref<8x8xbf16, #tpu.memory_space<vmem>>, vector<8x8xbf16>
    %69 = arith.truncf %67 : vector<8x256xf32> to vector<8x256xbf16>
    %cst_23 = arith.constant dense<0.000000e+00> : vector<8x256xf32>
    %70 = tpu.matmul %68, %69, %cst_23 {dimension_numbers = #tpu.dot_dimension_numbers<[1], [0], [0], [1], [0, 0, 1, 1], [], []>} : vector<8x8xbf16>, vector<8x256xbf16>, vector<8x256xf32> -> vector<8x256xf32>
    %c0_24 = arith.constant 0 : index
    %c0_25 = arith.constant 0 : index
    %71 = vector.load %arg5[%c0_24, %c0_25] : memref<8x1xf32, #tpu.memory_space<vmem>>, vector<8x1xf32>
    %72 = vector.broadcast %71 : vector<8x1xf32> to vector<8x256xf32>
    %73 = arith.addf %70, %72 : vector<8x256xf32>
    %c17_i32_26 = arith.constant 17 : i32
    %74 = tpu.dynamic_rotate %67 by %c17_i32_26 dim 1 : vector<8x256xf32>, i32 -> vector<8x256xf32>
    %cst_27 = arith.constant 0.000000e+00 : f32
    %75 = vector.shape_cast %13 : vector<1x256xi1> to vector<1x256xi1>
    %76 = vector.broadcast %75 : vector<1x256xi1> to vector<8x256xi1>
    %77 = vector.broadcast %cst_27 : f32 to vector<8x256xf32>
    %78 = arith.select %76, %74, %77 : vector<8x256xi1>, vector<8x256xf32>
    %c16_i32_28 = arith.constant 16 : i32
    %79 = tpu.dynamic_rotate %67 by %c16_i32_28 dim 1 : vector<8x256xf32>, i32 -> vector<8x256xf32>
    %cst_29 = arith.constant 0.000000e+00 : f32
    %80 = vector.shape_cast %6 : vector<1x256xi1> to vector<1x256xi1>
    %81 = vector.broadcast %80 : vector<1x256xi1> to vector<8x256xi1>
    %82 = vector.broadcast %cst_29 : f32 to vector<8x256xf32>
    %83 = arith.select %81, %79, %82 : vector<8x256xi1>, vector<8x256xf32>
    %c15_i32_30 = arith.constant 15 : i32
    %84 = tpu.dynamic_rotate %67 by %c15_i32_30 dim 1 : vector<8x256xf32>, i32 -> vector<8x256xf32>
    %cst_31 = arith.constant 0.000000e+00 : f32
    %85 = vector.shape_cast %14 : vector<1x256xi1> to vector<1x256xi1>
    %86 = vector.broadcast %85 : vector<1x256xi1> to vector<8x256xi1>
    %87 = vector.broadcast %cst_31 : f32 to vector<8x256xf32>
    %88 = arith.select %86, %84, %87 : vector<8x256xi1>, vector<8x256xf32>
    %c1_i32_32 = arith.constant 1 : i32
    %89 = tpu.dynamic_rotate %67 by %c1_i32_32 dim 1 : vector<8x256xf32>, i32 -> vector<8x256xf32>
    %cst_33 = arith.constant 0.000000e+00 : f32
    %90 = vector.shape_cast %10 : vector<1x256xi1> to vector<1x256xi1>
    %91 = vector.broadcast %90 : vector<1x256xi1> to vector<8x256xi1>
    %92 = vector.broadcast %cst_33 : f32 to vector<8x256xf32>
    %93 = arith.select %91, %89, %92 : vector<8x256xi1>, vector<8x256xf32>
    %c255_i32_34 = arith.constant 255 : i32
    %94 = tpu.dynamic_rotate %67 by %c255_i32_34 dim 1 : vector<8x256xf32>, i32 -> vector<8x256xf32>
    %cst_35 = arith.constant 0.000000e+00 : f32
    %95 = vector.shape_cast %12 : vector<1x256xi1> to vector<1x256xi1>
    %96 = vector.broadcast %95 : vector<1x256xi1> to vector<8x256xi1>
    %97 = vector.broadcast %cst_35 : f32 to vector<8x256xf32>
    %98 = arith.select %96, %94, %97 : vector<8x256xi1>, vector<8x256xf32>
    %c241_i32_36 = arith.constant 241 : i32
    %99 = tpu.dynamic_rotate %67 by %c241_i32_36 dim 1 : vector<8x256xf32>, i32 -> vector<8x256xf32>
    %cst_37 = arith.constant 0.000000e+00 : f32
    %100 = vector.shape_cast %15 : vector<1x256xi1> to vector<1x256xi1>
    %101 = vector.broadcast %100 : vector<1x256xi1> to vector<8x256xi1>
    %102 = vector.broadcast %cst_37 : f32 to vector<8x256xf32>
    %103 = arith.select %101, %99, %102 : vector<8x256xi1>, vector<8x256xf32>
    %c240_i32_38 = arith.constant 240 : i32
    %104 = tpu.dynamic_rotate %67 by %c240_i32_38 dim 1 : vector<8x256xf32>, i32 -> vector<8x256xf32>
    %cst_39 = arith.constant 0.000000e+00 : f32
    %105 = vector.shape_cast %8 : vector<1x256xi1> to vector<1x256xi1>
    %106 = vector.broadcast %105 : vector<1x256xi1> to vector<8x256xi1>
    %107 = vector.broadcast %cst_39 : f32 to vector<8x256xf32>
    %108 = arith.select %106, %104, %107 : vector<8x256xi1>, vector<8x256xf32>
    %c239_i32_40 = arith.constant 239 : i32
    %109 = tpu.dynamic_rotate %67 by %c239_i32_40 dim 1 : vector<8x256xf32>, i32 -> vector<8x256xf32>
    %cst_41 = arith.constant 0.000000e+00 : f32
    %110 = vector.shape_cast %16 : vector<1x256xi1> to vector<1x256xi1>
    %111 = vector.broadcast %110 : vector<1x256xi1> to vector<8x256xi1>
    %112 = vector.broadcast %cst_41 : f32 to vector<8x256xf32>
    %113 = arith.select %111, %109, %112 : vector<8x256xi1>, vector<8x256xf32>
    %114 = tpu.concatenate %78, %83, %88, %93, %67, %98, %103, %108, %113 in 0 : vector<8x256xf32>, vector<8x256xf32>, vector<8x256xf32>, vector<8x256xf32>, vector<8x256xf32>, vector<8x256xf32>, vector<8x256xf32>, vector<8x256xf32>, vector<8x256xf32> -> vector<72x256xf32>
    %115 = arith.truncf %114 : vector<72x256xf32> to vector<72x256xbf16>
    %c0_42 = arith.constant 0 : index
    %c0_43 = arith.constant 0 : index
    %116 = vector.load %arg6[%c0_42, %c0_43] : memref<8x72xbf16, #tpu.memory_space<vmem>>, vector<8x72xbf16>
    %cst_44 = arith.constant dense<0.000000e+00> : vector<8x256xf32>
    %117 = tpu.matmul %116, %115, %cst_44 {dimension_numbers = #tpu.dot_dimension_numbers<[1], [0], [0], [1], [0, 0, 1, 1], [], []>} : vector<8x72xbf16>, vector<72x256xbf16>, vector<8x256xf32> -> vector<8x256xf32>
    %c0_45 = arith.constant 0 : index
    %c0_46 = arith.constant 0 : index
    %118 = vector.load %arg7[%c0_45, %c0_46] : memref<8x1xf32, #tpu.memory_space<vmem>>, vector<8x1xf32>
    %119 = vector.broadcast %118 : vector<8x1xf32> to vector<8x256xf32>
    %120 = arith.addf %117, %119 : vector<8x256xf32>
    %cst_47 = arith.constant 0.000000e+00 : f32
    %121 = vector.broadcast %cst_47 : f32 to vector<8x256xf32>
    %122 = arith.maximumf %120, %121 : vector<8x256xf32>
    %c0_48 = arith.constant 0 : index
    %c0_49 = arith.constant 0 : index
    %123 = vector.load %arg8[%c0_48, %c0_49] : memref<8x8xbf16, #tpu.memory_space<vmem>>, vector<8x8xbf16>
    %124 = arith.truncf %122 : vector<8x256xf32> to vector<8x256xbf16>
    %cst_50 = arith.constant dense<0.000000e+00> : vector<8x256xf32>
    %125 = tpu.matmul %123, %124, %cst_50 {dimension_numbers = #tpu.dot_dimension_numbers<[1], [0], [0], [1], [0, 0, 1, 1], [], []>} : vector<8x8xbf16>, vector<8x256xbf16>, vector<8x256xf32> -> vector<8x256xf32>
    %c0_51 = arith.constant 0 : index
    %c0_52 = arith.constant 0 : index
    %126 = vector.load %arg9[%c0_51, %c0_52] : memref<8x1xf32, #tpu.memory_space<vmem>>, vector<8x1xf32>
    %127 = vector.broadcast %126 : vector<8x1xf32> to vector<8x256xf32>
    %128 = arith.addf %125, %127 : vector<8x256xf32>
    %129 = arith.addf %73, %128 : vector<8x256xf32>
    %c17_i32_53 = arith.constant 17 : i32
    %130 = tpu.dynamic_rotate %122 by %c17_i32_53 dim 1 : vector<8x256xf32>, i32 -> vector<8x256xf32>
    %cst_54 = arith.constant 0.000000e+00 : f32
    %131 = vector.shape_cast %13 : vector<1x256xi1> to vector<1x256xi1>
    %132 = vector.broadcast %131 : vector<1x256xi1> to vector<8x256xi1>
    %133 = vector.broadcast %cst_54 : f32 to vector<8x256xf32>
    %134 = arith.select %132, %130, %133 : vector<8x256xi1>, vector<8x256xf32>
    %c16_i32_55 = arith.constant 16 : i32
    %135 = tpu.dynamic_rotate %122 by %c16_i32_55 dim 1 : vector<8x256xf32>, i32 -> vector<8x256xf32>
    %cst_56 = arith.constant 0.000000e+00 : f32
    %136 = vector.shape_cast %6 : vector<1x256xi1> to vector<1x256xi1>
    %137 = vector.broadcast %136 : vector<1x256xi1> to vector<8x256xi1>
    %138 = vector.broadcast %cst_56 : f32 to vector<8x256xf32>
    %139 = arith.select %137, %135, %138 : vector<8x256xi1>, vector<8x256xf32>
    %c15_i32_57 = arith.constant 15 : i32
    %140 = tpu.dynamic_rotate %122 by %c15_i32_57 dim 1 : vector<8x256xf32>, i32 -> vector<8x256xf32>
    %cst_58 = arith.constant 0.000000e+00 : f32
    %141 = vector.shape_cast %14 : vector<1x256xi1> to vector<1x256xi1>
    %142 = vector.broadcast %141 : vector<1x256xi1> to vector<8x256xi1>
    %143 = vector.broadcast %cst_58 : f32 to vector<8x256xf32>
    %144 = arith.select %142, %140, %143 : vector<8x256xi1>, vector<8x256xf32>
    %c1_i32_59 = arith.constant 1 : i32
    %145 = tpu.dynamic_rotate %122 by %c1_i32_59 dim 1 : vector<8x256xf32>, i32 -> vector<8x256xf32>
    %cst_60 = arith.constant 0.000000e+00 : f32
    %146 = vector.shape_cast %10 : vector<1x256xi1> to vector<1x256xi1>
    %147 = vector.broadcast %146 : vector<1x256xi1> to vector<8x256xi1>
    %148 = vector.broadcast %cst_60 : f32 to vector<8x256xf32>
    %149 = arith.select %147, %145, %148 : vector<8x256xi1>, vector<8x256xf32>
    %c255_i32_61 = arith.constant 255 : i32
    %150 = tpu.dynamic_rotate %122 by %c255_i32_61 dim 1 : vector<8x256xf32>, i32 -> vector<8x256xf32>
    %cst_62 = arith.constant 0.000000e+00 : f32
    %151 = vector.shape_cast %12 : vector<1x256xi1> to vector<1x256xi1>
    %152 = vector.broadcast %151 : vector<1x256xi1> to vector<8x256xi1>
    %153 = vector.broadcast %cst_62 : f32 to vector<8x256xf32>
    %154 = arith.select %152, %150, %153 : vector<8x256xi1>, vector<8x256xf32>
    %c241_i32_63 = arith.constant 241 : i32
    %155 = tpu.dynamic_rotate %122 by %c241_i32_63 dim 1 : vector<8x256xf32>, i32 -> vector<8x256xf32>
    %cst_64 = arith.constant 0.000000e+00 : f32
    %156 = vector.shape_cast %15 : vector<1x256xi1> to vector<1x256xi1>
    %157 = vector.broadcast %156 : vector<1x256xi1> to vector<8x256xi1>
    %158 = vector.broadcast %cst_64 : f32 to vector<8x256xf32>
    %159 = arith.select %157, %155, %158 : vector<8x256xi1>, vector<8x256xf32>
    %c240_i32_65 = arith.constant 240 : i32
    %160 = tpu.dynamic_rotate %122 by %c240_i32_65 dim 1 : vector<8x256xf32>, i32 -> vector<8x256xf32>
    %cst_66 = arith.constant 0.000000e+00 : f32
    %161 = vector.shape_cast %8 : vector<1x256xi1> to vector<1x256xi1>
    %162 = vector.broadcast %161 : vector<1x256xi1> to vector<8x256xi1>
    %163 = vector.broadcast %cst_66 : f32 to vector<8x256xf32>
    %164 = arith.select %162, %160, %163 : vector<8x256xi1>, vector<8x256xf32>
    %c239_i32_67 = arith.constant 239 : i32
    %165 = tpu.dynamic_rotate %122 by %c239_i32_67 dim 1 : vector<8x256xf32>, i32 -> vector<8x256xf32>
    %cst_68 = arith.constant 0.000000e+00 : f32
    %166 = vector.shape_cast %16 : vector<1x256xi1> to vector<1x256xi1>
    %167 = vector.broadcast %166 : vector<1x256xi1> to vector<8x256xi1>
    %168 = vector.broadcast %cst_68 : f32 to vector<8x256xf32>
    %169 = arith.select %167, %165, %168 : vector<8x256xi1>, vector<8x256xf32>
    %170 = tpu.concatenate %134, %139, %144, %149, %122, %154, %159, %164, %169 in 0 : vector<8x256xf32>, vector<8x256xf32>, vector<8x256xf32>, vector<8x256xf32>, vector<8x256xf32>, vector<8x256xf32>, vector<8x256xf32>, vector<8x256xf32>, vector<8x256xf32> -> vector<72x256xf32>
    %171 = arith.truncf %170 : vector<72x256xf32> to vector<72x256xbf16>
    %c0_69 = arith.constant 0 : index
    %c0_70 = arith.constant 0 : index
    %172 = vector.load %arg10[%c0_69, %c0_70] : memref<8x72xbf16, #tpu.memory_space<vmem>>, vector<8x72xbf16>
    %cst_71 = arith.constant dense<0.000000e+00> : vector<8x256xf32>
    %173 = tpu.matmul %172, %171, %cst_71 {dimension_numbers = #tpu.dot_dimension_numbers<[1], [0], [0], [1], [0, 0, 1, 1], [], []>} : vector<8x72xbf16>, vector<72x256xbf16>, vector<8x256xf32> -> vector<8x256xf32>
    %c0_72 = arith.constant 0 : index
    %c0_73 = arith.constant 0 : index
    %174 = vector.load %arg11[%c0_72, %c0_73] : memref<8x1xf32, #tpu.memory_space<vmem>>, vector<8x1xf32>
    %175 = vector.broadcast %174 : vector<8x1xf32> to vector<8x256xf32>
    %176 = arith.addf %173, %175 : vector<8x256xf32>
    %cst_74 = arith.constant 0.000000e+00 : f32
    %177 = vector.broadcast %cst_74 : f32 to vector<8x256xf32>
    %178 = arith.maximumf %176, %177 : vector<8x256xf32>
    %c0_75 = arith.constant 0 : index
    %c0_76 = arith.constant 0 : index
    %179 = vector.load %arg12[%c0_75, %c0_76] : memref<8x8xbf16, #tpu.memory_space<vmem>>, vector<8x8xbf16>
    %180 = arith.truncf %178 : vector<8x256xf32> to vector<8x256xbf16>
    %cst_77 = arith.constant dense<0.000000e+00> : vector<8x256xf32>
    %181 = tpu.matmul %179, %180, %cst_77 {dimension_numbers = #tpu.dot_dimension_numbers<[1], [0], [0], [1], [0, 0, 1, 1], [], []>} : vector<8x8xbf16>, vector<8x256xbf16>, vector<8x256xf32> -> vector<8x256xf32>
    %c0_78 = arith.constant 0 : index
    %c0_79 = arith.constant 0 : index
    %182 = vector.load %arg13[%c0_78, %c0_79] : memref<8x1xf32, #tpu.memory_space<vmem>>, vector<8x1xf32>
    %183 = vector.broadcast %182 : vector<8x1xf32> to vector<8x256xf32>
    %184 = arith.addf %181, %183 : vector<8x256xf32>
    %185 = arith.addf %129, %184 : vector<8x256xf32>
    %cst_80 = arith.constant 0.000000e+00 : f32
    %186 = vector.broadcast %cst_80 : f32 to vector<8x256xf32>
    %187 = arith.maximumf %185, %186 : vector<8x256xf32>
    %188 = arith.truncf %187 : vector<8x256xf32> to vector<8x256xbf16>
    %c0_81 = arith.constant 0 : index
    %c0_82 = arith.constant 0 : index
    %189 = vector.load %arg14[%c0_81, %c0_82] : memref<4x8xbf16, #tpu.memory_space<vmem>>, vector<4x8xbf16>
    %cst_83 = arith.constant dense<0.000000e+00> : vector<4x256xf32>
    %190 = tpu.matmul %189, %188, %cst_83 {dimension_numbers = #tpu.dot_dimension_numbers<[1], [0], [0], [1], [0, 0, 1, 1], [], []>} : vector<4x8xbf16>, vector<8x256xbf16>, vector<4x256xf32> -> vector<4x256xf32>
    %c0_84 = arith.constant 0 : index
    %c0_85 = arith.constant 0 : index
    %191 = vector.load %arg15[%c0_84, %c0_85] : memref<4x1xf32, #tpu.memory_space<vmem>>, vector<4x1xf32>
    %192 = vector.broadcast %191 : vector<4x1xf32> to vector<4x256xf32>
    %193 = arith.addf %190, %192 : vector<4x256xf32>
    %c0_86 = arith.constant 0 : index
    %c0_87 = arith.constant 0 : index
    %c0_88 = arith.constant 0 : index
    %194 = vector.load %arg16[%c0_86, %c0_87, %c0_88] : memref<1x8x256xf32, #tpu.memory_space<vmem>>, vector<1x8x256xf32>
    %195 = vector.shape_cast %194 : vector<1x8x256xf32> to vector<8x256xf32>
    %196 = vector.shape_cast %178 : vector<8x256xf32> to vector<1x8x256xf32>
    tpu.vector_store %arg16[%c0_86, %c0_87, %c0_88], %196 {strides = array<i32>} : memref<1x8x256xf32, #tpu.memory_space<vmem>>, vector<1x8x256xf32>,
    %c0_89 = arith.constant 0 : index
    %c0_90 = arith.constant 0 : index
    %c0_91 = arith.constant 0 : index
    %197 = vector.load %arg17[%c0_89, %c0_90, %c0_91] : memref<1x4x256xf32, #tpu.memory_space<vmem>>, vector<1x4x256xf32>
    %198 = vector.shape_cast %197 : vector<1x4x256xf32> to vector<4x256xf32>
    %199 = vector.shape_cast %193 : vector<4x256xf32> to vector<1x4x256xf32>
    tpu.vector_store %arg17[%c0_89, %c0_90, %c0_91], %199 {strides = array<i32>} : memref<1x4x256xf32, #tpu.memory_space<vmem>>, vector<1x4x256xf32>,
    return
  }
  func.func @transform_0(%arg0: i32) -> (i32, i32, i32) {
    %c0_i32 = arith.constant 0 : i32
    %c0_i32_0 = arith.constant 0 : i32
    %c0_i32_1 = arith.constant 0 : i32
    return %arg0, %c0_i32, %c0_i32_0 : i32, i32, i32
  }
  func.func @transform_1(%arg0: i32) -> (i32, i32) {
    %c0_i32 = arith.constant 0 : i32
    %c0_i32_0 = arith.constant 0 : i32
    %c0_i32_1 = arith.constant 0 : i32
    return %c0_i32, %c0_i32_0 : i32, i32
  }
  func.func @transform_2(%arg0: i32) -> (i32, i32) {
    %c0_i32 = arith.constant 0 : i32
    %c0_i32_0 = arith.constant 0 : i32
    %c0_i32_1 = arith.constant 0 : i32
    return %c0_i32, %c0_i32_0 : i32, i32
  }
  func.func @transform_3(%arg0: i32) -> (i32, i32) {
    %c0_i32 = arith.constant 0 : i32
    %c0_i32_0 = arith.constant 0 : i32
    %c0_i32_1 = arith.constant 0 : i32
    return %c0_i32, %c0_i32_0 : i32, i32
  }
  func.func @transform_4(%arg0: i32) -> (i32, i32) {
    %c0_i32 = arith.constant 0 : i32
    %c0_i32_0 = arith.constant 0 : i32
    %c0_i32_1 = arith.constant 0 : i32
    return %c0_i32, %c0_i32_0 : i32, i32
  }
  func.func @transform_5(%arg0: i32) -> (i32, i32) {
    %c0_i32 = arith.constant 0 : i32
    %c0_i32_0 = arith.constant 0 : i32
    %c0_i32_1 = arith.constant 0 : i32
    return %c0_i32, %c0_i32_0 : i32, i32
  }
  func.func @transform_6(%arg0: i32) -> (i32, i32) {
    %c0_i32 = arith.constant 0 : i32
    %c0_i32_0 = arith.constant 0 : i32
    %c0_i32_1 = arith.constant 0 : i32
    return %c0_i32, %c0_i32_0 : i32, i32
  }
  func.func @transform_7(%arg0: i32) -> (i32, i32) {
    %c0_i32 = arith.constant 0 : i32
    %c0_i32_0 = arith.constant 0 : i32
    %c0_i32_1 = arith.constant 0 : i32
    return %c0_i32, %c0_i32_0 : i32, i32
  }
  func.func @transform_8(%arg0: i32) -> (i32, i32) {
    %c0_i32 = arith.constant 0 : i32
    %c0_i32_0 = arith.constant 0 : i32
    %c0_i32_1 = arith.constant 0 : i32
    return %c0_i32, %c0_i32_0 : i32, i32
  }
  func.func @transform_9(%arg0: i32) -> (i32, i32) {
    %c0_i32 = arith.constant 0 : i32
    %c0_i32_0 = arith.constant 0 : i32
    %c0_i32_1 = arith.constant 0 : i32
    return %c0_i32, %c0_i32_0 : i32, i32
  }
  func.func @transform_10(%arg0: i32) -> (i32, i32) {
    %c0_i32 = arith.constant 0 : i32
    %c0_i32_0 = arith.constant 0 : i32
    %c0_i32_1 = arith.constant 0 : i32
    return %c0_i32, %c0_i32_0 : i32, i32
  }
  func.func @transform_11(%arg0: i32) -> (i32, i32) {
    %c0_i32 = arith.constant 0 : i32
    %c0_i32_0 = arith.constant 0 : i32
    %c0_i32_1 = arith.constant 0 : i32
    return %c0_i32, %c0_i32_0 : i32, i32
  }
  func.func @transform_12(%arg0: i32) -> (i32, i32) {
    %c0_i32 = arith.constant 0 : i32
    %c0_i32_0 = arith.constant 0 : i32
    %c0_i32_1 = arith.constant 0 : i32
    return %c0_i32, %c0_i32_0 : i32, i32
  }
  func.func @transform_13(%arg0: i32) -> (i32, i32) {
    %c0_i32 = arith.constant 0 : i32
    %c0_i32_0 = arith.constant 0 : i32
    %c0_i32_1 = arith.constant 0 : i32
    return %c0_i32, %c0_i32_0 : i32, i32
  }
  func.func @transform_14(%arg0: i32) -> (i32, i32) {
    %c0_i32 = arith.constant 0 : i32
    %c0_i32_0 = arith.constant 0 : i32
    %c0_i32_1 = arith.constant 0 : i32
    return %c0_i32, %c0_i32_0 : i32, i32
  }
  func.func @transform_15(%arg0: i32) -> (i32, i32, i32) {
    %c0_i32 = arith.constant 0 : i32
    %c0_i32_0 = arith.constant 0 : i32
    %c0_i32_1 = arith.constant 0 : i32
    return %arg0, %c0_i32, %c0_i32_0 : i32, i32, i32
  }
  func.func @transform_16(%arg0: i32) -> (i32, i32, i32) {
    %c0_i32 = arith.constant 0 : i32
    %c0_i32_0 = arith.constant 0 : i32
    %c0_i32_1 = arith.constant 0 : i32
    return %arg0, %c0_i32, %c0_i32_0 : i32, i32, i32
  }
}

</mosaic_0001>

<bundles_post_ra>
// kernel: nonlinear_rcfnet_block.1
= control target key start
LH: loop header
LB: loop body
LE: loop exit
PB: predicated region body
PF: predicated region fallthrough
CT: control target
= control target key end

     0   :  { %s1685_s21 = smov 0   ;;  %s2114_s0 = inlined_call_operand.vmem [shape: f32[2,8,256], index: 0, kind: input, shape index: {}]   ;;  %s2115_s1 = inlined_call_operand.vmem [shape: bf16[8,72], index: 1, kind: input, shape index: {}]   ;;  %s2116_s2 = inlined_call_operand.vmem [shape: f32[8,1], index: 2, kind: input, shape index: {}]   ;;  %s2117_s3 = inlined_call_operand.vmem [shape: bf16[8,8], index: 3, kind: input, shape index: {}]   ;;  %s2118_s4 = inlined_call_operand.vmem [shape: f32[8,1], index: 4, kind: input, shape index: {}]   ;;  %s2119_s5 = inlined_call_operand.vmem [shape: bf16[8,72], index: 5, kind: input, shape index: {}]   ;;  %s2120_s6 = inlined_call_operand.vmem [shape: f32[8,1], index: 6, kind: input, shape index: {}]   ;;  %s2121_s7 = inlined_call_operand.vmem [shape: bf16[8,8], index: 7, kind: input, shape index: {}]   ;;  %s2122_s8 = inlined_call_operand.vmem [shape: f32[8,1], index: 8, kind: input, shape index: {}]   ;;  %s2123_s9 = inlined_call_operand.vmem [shape: bf16[8,72], index: 9, kind: input, shape index: {}]   ;;  %s2124_s10 = inlined_call_operand.vmem [shape: f32[8,1], index: 10, kind: input, shape index: {}]   ;;  %s2125_s11 = inlined_call_operand.vmem [shape: bf16[8,8], index: 11, kind: input, shape index: {}]   ;;  %s2126_s12 = inlined_call_operand.vmem [shape: f32[8,1], index: 12, kind: input, shape index: {}]   ;;  %s2127_s13 = inlined_call_operand.vmem [shape: bf16[4,8], index: 13, kind: input, shape index: {}]   ;;  %s2128_s14 = inlined_call_operand.vmem [shape: f32[4,1], index: 14, kind: input, shape index: {}]   ;;  %s2129_s15 = inlined_call_operand.vmem [shape: f32[2,8,256], index: 15, kind: output, shape index: {0}]   ;;  %s2130_s16 = inlined_call_operand.vmem [shape: f32[2,4,256], index: 16, kind: output, shape index: {1}]  }
   0x1   :  { %2142 = sst [smem:[#allocation2_spill]] %s2114_s0 }
   0x2 LB: > { %s1340_s22 = sadd.s32 4294967295, %s1588_s21   ;;  %p1344_p0 = scmp.ge.s32.totalorder %s1588_s21, 1  ;;  %s1588_s21 = sphi %s1685_s21, %s27_s21  }
   0x3   : > { %p465_p1 = scmp.lt.s32.totalorder %s1588_s21, 3 }
   0x5   : > { %p466_p2 = pnand %p1344_p0, %p465_p1 }
   0x6   : > { %p520_p3 = scmp.lt.s32.totalorder (!%p466_p2), %s1340_s22, 1  ;;  %s2143_s26 = sld [smem:[#allocation2_spill]] (!%p466_p2) }
   0x7   : > { %469 = sbr.rel (%p466_p2) target bundleno = 1457 (0x5b1), region = 80  ;;  %s1590_s28 = smov (!%p466_p2), 111  }
   0x8   : > { %s1591_s29 = smov (!%p466_p2), 112   ;;  %s1592_s30 = smov (!%p466_p2), 113  }
   0x9   : > { %s1593_s0 = smov (!%p466_p2), 127   ;;  %s1594_s17 = smov (!%p466_p2), 1  }
   0xa   : > { %s1595_s18 = smov (!%p466_p2), 15   ;;  %s1597_s19 = smov (!%p466_p2), 16  }
   0xb   : > { %s1598_s20 = smov (!%p466_p2), 17  }
   0xc   : > { %s2223_s22 = smov (!%p520_p3, %s1340_s22), 1  ;;  %v1596_v3 = vmov 0   ;;  %v676_v4 = vld [vmem:[%s2116_s2] sm:$0xff]  ;;  %v536_v5 = vlaneseq  ;;  %vm2136_vm8 = vcmask 1043456   ;;  %vm1599_vm15 = vmmov 1  }
   0xd   : > { %s1439_s23 = sshll.u32 %s2223_s22, 4  ;;  %725 = vmatprep.mubr.bf16.mxu0 %v1596_v3  ;;  %1500 = vset.pattern.permute.xlu0 %v1596_v3 }
   0xe   : > { %s524_s27 = scalar_lea.vmem %s2143_s26, %s1439_s23  ;;  %787 = vmatprep.mubr.bf16.mxu1 %v1596_v3  ;;  %1581 = vset.pattern.permute.xlu1 %v1596_v3  ;;  %v1722_v6 = vand.u32 127, %v536_v5  ;;  %s529_s24 = scalar_lea.vmem %s2129_s15, %s1439_s23 }
   0xf   : > { %v1701_v0 = vld [vmem:[%s524_s27] sm:$0xff]  ;;  %v1703_v1 = vld [vmem:[%s524_s27 + $0x8] sm:$0xff] }
  0x10   : > { %v1460_v2 = vpack.i.bf16 %v1703_v1, %v1701_v0  ;;  %v538_v7 = vadd.s32 128, %v1722_v6  ;;  %v541_v10 = vand.u32 15, %v1722_v6  ;;  %vm2133_vm2 = vcmp.lt.s32.totalorder %v1722_v6, 112 }
  0x11   : > { %vm2134_vm3 = vcmp.lt.s32.totalorder %v1722_v6, 111  ;;  %vm2132_vm7 = vcmp.lt.s32.totalorder %v1722_v6, 113  ;;  %vm2131_vm9 = vcmp.lt.s32.totalorder %v1722_v6, 127  ;;  %v539_v37 = vand.u32 255, %v1722_v6 }
  0x12   : > { %1461 = vrot.lane.b32.xlu0 %v1460_v2, %s1590_s28  ;;  %1471 = vrot.lane.b32.xlu1 %v1460_v2, %s1591_s29  ;;  %v540_v8 = vand.u32 255, %v538_v7  ;;  %v542_v9 = vand.u32 15, %v538_v7  ;;  %vm1736_vm4 = vcmp.lt.s32.totalorder %v541_v10, 15  ;;  %vm1770_vm11 = vcmp.ge.s32.totalorder %v541_v10, 1  ;;  %v1064_v7 = vld [vmem:[%s2123_s9] sm:$0xf] }
  0x13   : > { %vm2135_vm13 = vcmp.lt.s32.totalorder %v1722_v6, 1  ;;  %vm2137_vm14 = vcmp.lt.s32.totalorder %v1722_v6, 15 }
  0x14   : > { %vm1726_vm0 = vcmp.lt.s32.totalorder %v540_v8, 240  ;;  %vm1730_vm1 = vcmp.lt.s32.totalorder %v542_v9, 15  ;;  %vm1740_vm5 = vcmp.ge.s32.totalorder %v542_v9, 1 }
  0x15   : > { %vm1748_vm6 = vmand %vm1726_vm0, %vm1730_vm1 }
  0x16   : > { %1466 = vrot.lane.b32.xlu0 %v1460_v2, %s1592_s30  ;;  %1476 = vrot.lane.b32.xlu1 %v1460_v2, %s1593_s0  ;;  %vm556_vm10 = vmand %vm1726_vm0, %vm1740_vm5 }
  0x17   : > { %vm1783_vm12 = vmpackc.low %vm1726_vm0, %vm556_vm10 }
  0x18   : > { %vm1797_vm0 = vmpackc.low %vm1599_vm15, %vm1770_vm11 }
  0x19   : > { %vm1806_vm10 = vmpackc.low %vm1730_vm1, %vm1599_vm15 }
  0x1a   : > { %1486 = vrot.lane.b32.xlu1 %v1460_v2, %s1594_s17  ;;  %1481 = vrot.lane.b32.xlu0 %v1460_v2, %s1595_s18 }
  0x1e   : > { %1496 = vrot.lane.b32.xlu1 %v1460_v2, %s1597_s19  ;;  %1491 = vrot.lane.b32.xlu0 %v1460_v2, %s1598_s20 }
  0x22   : > { %679 = vperm.xlu0 %1500, %v676_v4  }
  0x84   : > { %v1462_v13 = vpop.permute.xlu0 %1461  ;;  %v1472_v14 = vpop.permute.xlu1 %1471 }
  0x85   : > { %v1464_v17 = vunpack.i.h.bf16 %v1462_v13  ;;  %v1463_v18 = vunpack.i.l.bf16 %v1462_v13  ;;  %v1474_v19 = vunpack.i.h.bf16 %v1472_v14  ;;  %v1473_v20 = vunpack.i.l.bf16 %v1472_v14 }
  0x87   : > { %v658_v22 = vsel %vm2134_vm3, %v1464_v17, %v1463_v18  ;;  %v657_v23 = vsel %vm2134_vm3, %v1463_v18, %v1464_v17  ;;  %v644_v24 = vsel %vm2133_vm2, %v1473_v20, %v1474_v19  ;;  %v645_v25 = vsel %vm2133_vm2, %v1474_v19, %v1473_v20  ;;  %vm1827_vm2 = vmpackc.low %vm1736_vm4, %vm1599_vm15  ;;  %v675_v19 = vld [vmem:[%s2115_s1] sm:$0xf] }
  0x88   : > { %v1467_v26 = vpop.permute.xlu0 %1466  ;;  %v664_v27 = vsel %vm1748_vm6, %v658_v22, 0.0  ;;  %v663_v28 = vsel %vm1736_vm4, %v657_v23, 0.0  ;;  %v1477_v29 = vpop.permute.xlu1 %1476  ;;  %vm2141_vm3 = vcmp.lt.s32.totalorder %v1722_v6, 17 }
  0x89   : > { %v1469_v30 = vunpack.i.h.bf16 %v1467_v26  ;;  %v1468_v31 = vunpack.i.l.bf16 %v1467_v26  ;;  %v674_v32 = vpack.c.bf16 %v664_v27, %v664_v27  ;;  %v673_v33 = vpack.c.bf16 %v663_v28, %v663_v28 }
  0x8a   : > { %v1479_v34 = vunpack.i.h.bf16 %v1477_v29  ;;  %v1478_v35 = vunpack.i.l.bf16 %v1477_v29 }
  0x8b   : > { %v631_v38 = vsel %vm2132_vm7, %v1468_v31, %v1469_v30  ;;  %v632_v39 = vsel %vm2132_vm7, %v1469_v30, %v1468_v31  ;;  %1351 = vmatprep.subr.msk.bf16.mxu0 %vm2136_vm8, %v674_v32  ;;  %v688_v40 = vsel %vm2136_vm8, %v673_v33, 0  ;;  %vm2138_vm7 = vcmp.lt.s32.totalorder %v1722_v6, 16  ;;  %vm1844_vm8 = vmpackc.low %vm1740_vm5, %vm1730_vm1 }
  0x8c   : > { %v1353_v42 = vpack.c.bf16 %v645_v25, %v632_v39  ;;  %v1356_v43 = vpack.c.bf16 %v644_v24, %v631_v38  ;;  %700 = vmatpush1.bf16.msra.mxu0 %v688_v40  ;;  %v619_v44 = vsel %vm2131_vm9, %v1479_v34, %v1478_v35  ;;  %v1487_v45 = vpop.permute.xlu1 %1486  ;;  %v1482_v46 = vpop.permute.xlu0 %1481  ;;  %v618_v47 = vsel %vm2131_vm9, %v1478_v35, %v1479_v34  ;;  %vm1869_vm1 = vmpackc.low %vm1599_vm15, %vm1740_vm5  ;;  %v736_v34 = vld [vmem:[%s2117_s3] sm:$0xf] }
  0x8d   : > { %v1359_v48 = vpack.c.bf16 %v619_v44, %v1703_v1  ;;  %v1489_v50 = vunpack.i.h.bf16 %v1487_v45  ;;  %v1488_v51 = vunpack.i.l.bf16 %v1487_v45  ;;  %v1484_v52 = vunpack.i.h.bf16 %v1482_v46  ;;  %v871_v35 = vld [vmem:[%s2120_s6] sm:$0xff] }
  0x8e   : > { %1354 = vmatprep.subr.msk.bf16.mxu0 %vm1783_vm12, %v1353_v42  ;;  %v1483_v53 = vunpack.i.l.bf16 %v1482_v46  ;;  %vm1810_vm9 = vcmp.ge.s32.totalorder %v539_v37, 16  ;;  %v1362_v57 = vpack.c.bf16 %v618_v47, %v1701_v0  ;;  %vm2140_vm5 = vcmask 588800  }
  0x8f   : > { %v605_v56 = vsel %vm2135_vm13, %v1488_v51, %v1489_v50  ;;  %v606_v58 = vsel %vm2135_vm13, %v1489_v50, %v1488_v51  ;;  %vm553_vm13 = vmand %vm1810_vm9, %vm1736_vm4  ;;  %vm2139_vm15 = vcmask 64512  }
  0x90   : > { %1357 = vmatpush1.bf16.msk.msra.mxu0 %vm1797_vm0, %v1356_v43  ;;  %v592_v59 = vsel %vm2137_vm14, %v1483_v53, %v1484_v52  ;;  %v1497_v61 = vpop.permute.xlu1 %1496  ;;  %v1492_v62 = vpop.permute.xlu0 %1491  ;;  %v593_v63 = vsel %vm2137_vm14, %v1484_v52, %v1483_v53  ;;  %vm1856_vm14 = vmpackc.low %vm1770_vm11, %vm553_vm13 }
  0x91   : > { %v1365_v0 = vpack.c.bf16 %v605_v56, %v592_v59  ;;  %1360 = vmatprep.subr.msk.bf16.mxu0 %vm1806_vm10, %v1359_v48  ;;  %v1499_v1 = vunpack.i.h.bf16 %v1497_v61  ;;  %v1498_v2 = vunpack.i.l.bf16 %v1497_v61  ;;  %v1494_v4 = vunpack.i.h.bf16 %v1492_v62  ;;  %vm551_vm13 = vmand %vm1810_vm9, %vm1770_vm11 }
  0x92   : > { %v1493_v5 = vunpack.i.l.bf16 %v1492_v62  ;;  %v1368_v9 = vpack.c.bf16 %v606_v58, %v593_v63 }
  0x93   : > { %v579_v8 = vsel %vm2138_vm7, %v1498_v2, %v1499_v1  ;;  %v580_v12 = vsel %vm2138_vm7, %v1499_v1, %v1498_v2  ;;  %vm1883_vm7 = vmpackc.low %vm1810_vm9, %vm551_vm13  ;;  %vm2174_vm9 = vcmask 1043456   ;;  %vm2176_vm13 = vcmp.lt.s32.totalorder %v1722_v6, 111 }
  0x94   : > { %1363 = vmatpush1.bf16.msk.msra.mxu0 %vm1827_vm2, %v1362_v57  ;;  %v566_v10 = vsel %vm2141_vm3, %v1493_v5, %v1494_v4  ;;  %v567_v13 = vsel %vm2141_vm3, %v1494_v4, %v1493_v5  ;;  %vm2175_vm11 = vmmov %vm2174_vm9 }
  0x95   : > { %v1371_v14 = vpack.c.bf16 %v579_v8, %v566_v10  ;;  %1366 = vmatprep.subr.msk.bf16.mxu0 %vm1844_vm8, %v1365_v0  ;;  %v1374_v18 = vpack.c.bf16 %v580_v12, %v567_v13 }
  0x98   : > { %1369 = vmatpush1.bf16.msk.msra.mxu0 %vm1856_vm14, %v1368_v9 }
  0x99   : > { %1372 = vmatprep.subr.msk.bf16.mxu0 %vm1869_vm1, %v1371_v14 }
  0x9c   : > { %1375 = vmatpush1.bf16.msk.msra.mxu0 %vm1883_vm7, %v1374_v18 }
  0x9d   : > { %v680_v20 = vpop.permute.xlu0 %679 }
  0x9f   : > { %1376 = vmatmul.mubr.msk.bf16.vlgmr.msra.gmra.mxu0 %vm2140_vm5, %v675_v19 }
  0xa0   : > { %979 = vmatprep.mubr.bf16.mxu0 %v1596_v3 }
 0x15f   : > { %v727_v22 = vpop.f32.mrf.mxu0 }
 0x160   : > { %v728_v23 = vadd.f32 %v727_v22, %v680_v20 }
 0x161   : > { %v729_v24 = vpop.f32.mrf.mxu0 }
 0x162   : > { %v1894_v25 = vmax.f32 %v728_v23, 0.0  ;;  %v730_v26 = vadd.f32 %v729_v24, %v680_v20 }
 0x163   : > { %v731_v27 = vpop.f32.mrf.mxu0 }
 0x164   : > { %v1896_v28 = vmax.f32 %v730_v26, 0.0  ;;  %v737_v29 = vpack.c.bf16 %v1894_v25, %v1894_v25 }
 0x165   : > { %v732_v30 = vpop.f32.mrf.mxu0 }
 0x166   : > { %v738_v31 = vpack.c.bf16 %v1896_v28, %v1896_v28  ;;  %v1511_v32 = vpack.i.bf16 %v1896_v28, %v1894_v25  ;;  %v750_v33 = vsel %vm2175_vm11, %v737_v29, 0  ;;  %vm2178_vm11 = vcmp.lt.s32.totalorder %v1722_v6, 112 }
 0x167   : > { %vm2183_vm3 = vmmov %vm2178_vm11 }
 0x168   : > { %1377 = vmatprep.subr.msk.bf16.mxu1 %vm2174_vm9, %v738_v31  ;;  %1512 = vrot.lane.b32.xlu0 %v1511_v32, %s1591_s29  ;;  %vm2177_vm9 = vmmov %vm2176_vm13 }
 0x169   : > { %1502 = vrot.lane.b32.xlu1 %v1511_v32, %s1590_s28  ;;  %770 = vmatpush1.bf16.msra.mxu1 %v750_v33 }
 0x16c   : > { %1522 = vrot.lane.b32.xlu0 %v1511_v32, %s1595_s18  ;;  %1378 = vmatmul.mubr.msk.bf16.vlgmr.msra.gmra.mxu1 %vm2139_vm15, %v736_v34  ;;  %vm2181_vm15 = vcmask 1043456  }
 0x16d   : > { %1507 = vrot.lane.b32.xlu1 %v1511_v32, %s1592_s30  ;;  %918 = vmatprep.mubr.bf16.mxu1 %v1596_v3  ;;  %vm2182_vm5 = vmmov %vm2181_vm15 }
 0x170   : > { %1532 = vrot.lane.b32.xlu0 %v1511_v32, %s1598_s20 }
 0x171   : > { %1517 = vrot.lane.b32.xlu1 %v1511_v32, %s1593_s0 }
 0x174   : > { %874 = vperm.xlu0 %1500, %v871_v35  }
 0x175   : > { %1527 = vrot.lane.b32.xlu1 %v1511_v32, %s1594_s17 }
 0x179   : > { %1537 = vrot.lane.b32.xlu1 %v1511_v32, %s1597_s19 }
 0x1da   : > { %v1513_v36 = vpop.permute.xlu0 %1512 }
 0x1db   : > { %v1503_v37 = vpop.permute.xlu1 %1502  ;;  %v1515_v40 = vunpack.i.h.bf16 %v1513_v36  ;;  %v1514_v42 = vunpack.i.l.bf16 %v1513_v36 }
 0x1dc   : > { %v1505_v38 = vunpack.i.h.bf16 %v1503_v37  ;;  %v1504_v39 = vunpack.i.l.bf16 %v1503_v37  ;;  %v870_v37 = vld [vmem:[%s2119_s5] sm:$0xf] }
 0x1dd   : > { %v849_v55 = vsel %vm2178_vm11, %v1515_v40, %v1514_v42  ;;  %v848_v62 = vsel %vm2183_vm3, %v1514_v42, %v1515_v40  ;;  %vm2184_vm11 = vcmp.lt.s32.totalorder %v1722_v6, 127  ;;  %vm2186_vm3 = vcmp.lt.s32.totalorder %v1722_v6, 15 }
 0x1de   : > { %v856_v43 = vsel %vm2176_vm13, %v1504_v39, %v1505_v38  ;;  %v857_v44 = vsel %vm2177_vm9, %v1505_v38, %v1504_v39  ;;  %v1523_v53 = vpop.permute.xlu0 %1522  ;;  %vm2179_vm13 = vcmp.lt.s32.totalorder %v1722_v6, 113 }
 0x1df   : > { %v859_v45 = vsel %vm1748_vm6, %v857_v44, 0.0  ;;  %v1508_v46 = vpop.permute.xlu1 %1507  ;;  %v858_v47 = vsel %vm1736_vm4, %v856_v43, 0.0  ;;  %vm2180_vm9 = vmmov %vm2179_vm13  ;;  %v1525_v1 = vunpack.i.h.bf16 %v1523_v53  ;;  %v1524_v2 = vunpack.i.l.bf16 %v1523_v53 }
 0x1e0   : > { %v1510_v48 = vunpack.i.h.bf16 %v1508_v46  ;;  %v1509_v50 = vunpack.i.l.bf16 %v1508_v46  ;;  %v869_v51 = vpack.c.bf16 %v859_v45, %v859_v45  ;;  %v868_v52 = vpack.c.bf16 %v858_v47, %v858_v47 }
 0x1e1   : > { %v816_v18 = vsel %vm2186_vm3, %v1524_v2, %v1525_v1 }
 0x1e2   : > { %v840_v56 = vsel %vm2179_vm13, %v1509_v50, %v1510_v48  ;;  %v841_v57 = vsel %vm2180_vm9, %v1510_v48, %v1509_v50  ;;  %1379 = vmatprep.subr.msk.bf16.mxu1 %vm2181_vm15, %v869_v51  ;;  %v881_v58 = vsel %vm2182_vm5, %v868_v52, 0  ;;  %vm2185_vm15 = vmmov %vm2184_vm11  ;;  %v1533_v9 = vpop.permute.xlu0 %1532  ;;  %vm2187_vm5 = vcmp.lt.s32.totalorder %v1722_v6, 1 }
 0x1e3   : > { %v1381_v59 = vpack.c.bf16 %v849_v55, %v841_v57  ;;  %v1518_v61 = vpop.permute.xlu1 %1517  ;;  %893 = vmatpush1.bf16.msra.mxu1 %v881_v58  ;;  %v1384_v4 = vpack.c.bf16 %v848_v62, %v840_v56  ;;  %v1535_v20 = vunpack.i.h.bf16 %v1533_v9  ;;  %v1534_v22 = vunpack.i.l.bf16 %v1533_v9  ;;  %vm2188_vm13 = vmmov %vm2187_vm5  ;;  %v929_v58 = vld [vmem:[%s2121_s7] sm:$0xf] }
 0x1e4   : > { %v1520_v63 = vunpack.i.h.bf16 %v1518_v61  ;;  %v1519_v0 = vunpack.i.l.bf16 %v1518_v61  ;;  %vm2189_vm9 = vmmov %vm2186_vm3  ;;  %v1065_v61 = vld [vmem:[%s2124_s10] sm:$0xff] }
 0x1e5   : > { %1382 = vmatprep.subr.msk.bf16.mxu1 %vm1783_vm12, %v1381_v59  ;;  %v739_v59 = vld [vmem:[%s2118_s4] sm:$0xff] }
 0x1e6   : > { %v832_v5 = vsel %vm2184_vm11, %v1519_v0, %v1520_v63  ;;  %v833_v8 = vsel %vm2185_vm15, %v1520_v63, %v1519_v0  ;;  %vm2190_vm11 = vcmp.lt.s32.totalorder %v1722_v6, 17  ;;  %vm2191_vm15 = vcmp.lt.s32.totalorder %v1722_v6, 16  ;;  %v1126_v62 = vld [vmem:[%s2126_s12] sm:$0xff] }
 0x1e7   : > { %v1387_v10 = vpack.c.bf16 %v833_v8, %v1896_v28  ;;  %v1528_v12 = vpop.permute.xlu1 %1527  ;;  %1385 = vmatpush1.bf16.msk.msra.mxu1 %vm1797_vm0, %v1384_v4  ;;  %v1390_v19 = vpack.c.bf16 %v832_v5, %v1894_v25  ;;  %v817_v28 = vsel %vm2189_vm9, %v1525_v1, %v1524_v2  ;;  %v800_v31 = vsel %vm2190_vm11, %v1534_v22, %v1535_v20  ;;  %vm2192_vm3 = vmmov %vm2191_vm15  ;;  %v932_v63 = vld [vmem:[%s2122_s8] sm:$0xff] }
 0x1e8   : > { %v1530_v13 = vunpack.i.h.bf16 %v1528_v12  ;;  %v1529_v14 = vunpack.i.l.bf16 %v1528_v12  ;;  %vm2195_vm9 = vcmask 1043456   ;;  %v1189_v0 = vld [vmem:[%s2128_s14] sm:$0xf] }
 0x1e9   : > { %1388 = vmatprep.subr.msk.bf16.mxu1 %vm1806_vm10, %v1387_v10 }
 0x1ea   : > { %v824_v23 = vsel %vm2187_vm5, %v1529_v14, %v1530_v13  ;;  %v825_v24 = vsel %vm2188_vm13, %v1530_v13, %v1529_v14  ;;  %vm2193_vm5 = vmmov %vm2190_vm11  ;;  %vm2194_vm13 = vcmask 588800  }
 0x1eb   : > { %v1393_v26 = vpack.c.bf16 %v824_v23, %v816_v18  ;;  %v1538_v27 = vpop.permute.xlu1 %1537  ;;  %1391 = vmatpush1.bf16.msk.msra.mxu1 %vm1827_vm2, %v1390_v19  ;;  %v1396_v30 = vpack.c.bf16 %v825_v24, %v817_v28  ;;  %v801_v35 = vsel %vm2193_vm5, %v1535_v20, %v1534_v22  ;;  %vm2196_vm11 = vmmov %vm2195_vm9 }
 0x1ec   : > { %v1540_v25 = vunpack.i.h.bf16 %v1538_v27  ;;  %v1539_v29 = vunpack.i.l.bf16 %v1538_v27 }
 0x1ed   : > { %1394 = vmatprep.subr.msk.bf16.mxu1 %vm1844_vm8, %v1393_v26 }
 0x1ee   : > { %v808_v32 = vsel %vm2191_vm15, %v1539_v29, %v1540_v25  ;;  %v809_v33 = vsel %vm2192_vm3, %v1540_v25, %v1539_v29  ;;  %vm2197_vm15 = vcmask 64512   ;;  %vm2198_vm3 = vcmp.lt.s32.totalorder %v1722_v6, 111 }
 0x1ef   : > { %v1399_v34 = vpack.c.bf16 %v808_v32, %v800_v31  ;;  %1397 = vmatpush1.bf16.msk.msra.mxu1 %vm1856_vm14, %v1396_v30  ;;  %v1402_v36 = vpack.c.bf16 %v809_v33, %v801_v35  ;;  %v875_v43 = vpop.permute.xlu0 %874  ;;  %vm2199_vm5 = vmmov %vm2198_vm3 }
 0x1f1   : > { %1400 = vmatprep.subr.msk.bf16.mxu1 %vm1869_vm1, %v1399_v34 }
 0x1f3   : > { %1403 = vmatpush1.bf16.msk.msra.mxu1 %vm1883_vm7, %v1402_v36 }
 0x1f6   : > { %1404 = vmatmul.mubr.msk.bf16.vlgmr.msra.gmra.mxu1 %vm2194_vm13, %v870_v37  ;;  %vm2200_vm13 = vcmp.lt.s32.totalorder %v1722_v6, 113 }
 0x1f7   : > { %1112 = vmatprep.mubr.bf16.mxu1 %v1596_v3 }
 0x22c   : > { %v1983_v38 = vpop.f32.mrf.mxu1 }
 0x22e   : > { %v1985_v39 = vpop.f32.mrf.mxu1 }
 0x230   : > { %v793_v40 = vpop.f32.mrf.mxu1 }
 0x232   : > { %v794_v42 = vpop.f32.mrf.mxu1 }
 0x2b6   : > { %v920_v44 = vpop.f32.mrf.mxu1 }
 0x2b7   : > { %v921_v45 = vadd.f32 %v920_v44, %v875_v43 }
 0x2b8   : > { %v922_v46 = vpop.f32.mrf.mxu1 }
 0x2b9   : > { %v1987_v47 = vmax.f32 %v921_v45, 0.0  ;;  %v923_v48 = vadd.f32 %v922_v46, %v875_v43 }
 0x2ba   : > { %v924_v50 = vpop.f32.mrf.mxu1 }
 0x2bb   : > { %v1989_v51 = vmax.f32 %v923_v48, 0.0  ;;  %v930_v52 = vpack.c.bf16 %v1987_v47, %v1987_v47 }
 0x2bc   : > { %v925_v53 = vpop.f32.mrf.mxu1 }
 0x2bd   : > { %v931_v55 = vpack.c.bf16 %v1989_v51, %v1989_v51  ;;  %v1546_v56 = vpack.i.bf16 %v1989_v51, %v1987_v47  ;;  %v942_v57 = vsel %vm2196_vm11, %v930_v52, 0 }
 0x2bf   : > { %1405 = vmatprep.subr.msk.bf16.mxu0 %vm2195_vm9, %v931_v55  ;;  %1547 = vrot.lane.b32.xlu0 %v1546_v56, %s1592_s30  ;;  %vm2201_vm9 = vcmp.lt.s32.totalorder %v1722_v6, 112 }
 0x2c0   : > { %1542 = vrot.lane.b32.xlu1 %v1546_v56, %s1590_s28  ;;  %962 = vmatpush1.bf16.msra.mxu0 %v942_v57 }
 0x2c3   : > { %1557 = vrot.lane.b32.xlu0 %v1546_v56, %s1593_s0  ;;  %1406 = vmatmul.mubr.msk.bf16.vlgmr.msra.gmra.mxu0 %vm2197_vm15, %v929_v58  ;;  %vm2204_vm15 = vcmp.lt.s32.totalorder %v1722_v6, 127 }
 0x2c4   : > { %1552 = vrot.lane.b32.xlu1 %v1546_v56, %s1591_s29  ;;  %1173 = vmatprep.mubr.bf16.mxu0 %v1596_v3 }
 0x2c7   : > { %1567 = vrot.lane.b32.xlu0 %v1546_v56, %s1594_s17  ;;  %s1441_s17 = sshll.u32 %s2223_s22, 3 }
 0x2c8   : > { %1562 = vrot.lane.b32.xlu1 %v1546_v56, %s1595_s18 }
 0x2cb   : > { %1577 = vrot.lane.b32.xlu0 %v1546_v56, %s1597_s19 }
 0x2cc   : > { %1572 = vrot.lane.b32.xlu1 %v1546_v56, %s1598_s20  ;;  %s534_s20 = scalar_lea.vmem %s2130_s16, %s1441_s17 }
 0x2cf   : > { %742 = vperm.xlu0 %1500, %v739_v59  }
 0x2d0   : > { %1068 = vperm.xlu1 %1581, %v1065_v61  }
 0x2d3   : > { %1129 = vperm.xlu0 %1500, %v1126_v62  }
 0x2d4   : > { %935 = vperm.xlu1 %1581, %v932_v63  }
 0x2d8   : > { %1192 = vperm.xlu1 %1581, %v1189_v0  }
 0x331   : > { %v1548_v1 = vpop.permute.xlu0 %1547 }
 0x332   : > { %v1543_v2 = vpop.permute.xlu1 %1542  ;;  %v1550_v8 = vunpack.i.h.bf16 %v1548_v1  ;;  %v1549_v9 = vunpack.i.l.bf16 %v1548_v1 }
 0x333   : > { %v1545_v4 = vunpack.i.h.bf16 %v1543_v2  ;;  %v1544_v5 = vunpack.i.l.bf16 %v1543_v2 }
 0x334   : > { %v1035_v28 = vsel %vm2200_vm13, %v1550_v8, %v1549_v9 }
 0x335   : > { %v1050_v10 = vsel %vm2198_vm3, %v1544_v5, %v1545_v4  ;;  %v1051_v12 = vsel %vm2199_vm5, %v1545_v4, %v1544_v5  ;;  %v1558_v13 = vpop.permute.xlu0 %1557  ;;  %vm2205_vm3 = vmmov %vm2200_vm13  ;;  %vm2207_vm13 = vcmp.lt.s32.totalorder %v1722_v6, 1 }
 0x336   : > { %v1053_v14 = vsel %vm1748_vm6, %v1051_v12, 0.0  ;;  %v1553_v18 = vpop.permute.xlu1 %1552  ;;  %v1052_v19 = vsel %vm1736_vm4, %v1050_v10, 0.0  ;;  %v1560_v26 = vunpack.i.h.bf16 %v1558_v13  ;;  %v1559_v27 = vunpack.i.l.bf16 %v1558_v13  ;;  %vm2202_vm6 = vmmov %vm2201_vm9 }
 0x337   : > { %v1555_v20 = vunpack.i.h.bf16 %v1553_v18  ;;  %v1554_v22 = vunpack.i.l.bf16 %v1553_v18  ;;  %v1063_v23 = vpack.c.bf16 %v1053_v14, %v1053_v14  ;;  %v1062_v24 = vpack.c.bf16 %v1052_v19, %v1052_v19  ;;  %vm2203_vm4 = vmmov %vm2196_vm11  ;;  %v1123_v14 = vld [vmem:[%s2125_s11] sm:$0xf] }
 0x338   : > { %v1027_v36 = vsel %vm2204_vm15, %v1560_v26, %v1559_v27  ;;  %v1034_v37 = vsel %vm2205_vm3, %v1549_v9, %v1550_v8  ;;  %vm2206_vm5 = vmmov %vm2204_vm15 }
 0x339   : > { %v1043_v25 = vsel %vm2201_vm9, %v1555_v20, %v1554_v22  ;;  %1407 = vmatprep.subr.msk.bf16.mxu1 %vm2196_vm11, %v1063_v23  ;;  %v1568_v21 = vpop.permute.xlu0 %1567  ;;  %v1042_v29 = vsel %vm2202_vm6, %v1554_v22, %v1555_v20  ;;  %v1075_v35 = vsel %vm2203_vm4, %v1062_v24, 0  ;;  %v1026_v44 = vsel %vm2206_vm5, %v1559_v27, %v1560_v26 }
 0x33a   : > { %v1409_v15 = vpack.c.bf16 %v1043_v25, %v1035_v28  ;;  %v1570_v30 = vunpack.i.h.bf16 %v1568_v21  ;;  %v1563_v31 = vpop.permute.xlu1 %1562  ;;  %v1569_v32 = vunpack.i.l.bf16 %v1568_v21  ;;  %1087 = vmatpush1.bf16.msra.mxu1 %v1075_v35  ;;  %v1412_v42 = vpack.c.bf16 %v1042_v29, %v1034_v37 }
 0x33b   : > { %v1565_v33 = vunpack.i.h.bf16 %v1563_v31  ;;  %v1564_v34 = vunpack.i.l.bf16 %v1563_v31  ;;  %v1415_v45 = vpack.c.bf16 %v1027_v36, %v1989_v51  ;;  %vm2208_vm9 = vcmp.lt.s32.totalorder %v1722_v6, 15 }
 0x33c   : > { %1410 = vmatprep.subr.msk.bf16.mxu1 %vm1783_vm12, %v1409_v15  ;;  %v1018_v46 = vsel %vm2207_vm13, %v1569_v32, %v1570_v30  ;;  %v1418_v41 = vpack.c.bf16 %v1026_v44, %v1987_v47  ;;  %vm2209_vm12 = vmmov %vm2207_vm13  ;;  %vm2211_vm6 = vcmp.lt.s32.totalorder %v1722_v6, 16  ;;  %vm2212_vm4 = vcmp.lt.s32.totalorder %v1722_v6, 17 }
 0x33d   : > { %v1578_v40 = vpop.permute.xlu0 %1577  ;;  %v1010_v48 = vsel %vm2208_vm9, %v1564_v34, %v1565_v33  ;;  %v1019_v51 = vsel %vm2209_vm12, %v1570_v30, %v1569_v32  ;;  %vm2210_vm11 = vmmov %vm2208_vm9 }
 0x33e   : > { %v1573_v43 = vpop.permute.xlu1 %1572  ;;  %v1580_v50 = vunpack.i.h.bf16 %v1578_v40  ;;  %v1579_v52 = vunpack.i.l.bf16 %v1578_v40  ;;  %1413 = vmatpush1.bf16.msk.msra.mxu1 %vm1797_vm0, %v1412_v42  ;;  %v1011_v56 = vsel %vm2210_vm11, %v1565_v33, %v1564_v34  ;;  %v1421_v57 = vpack.c.bf16 %v1018_v46, %v1010_v48  ;;  %vm2213_vm0 = vmmov %vm2211_vm6 }
 0x33f   : > { %v1575_v53 = vunpack.i.h.bf16 %v1573_v43  ;;  %v1574_v55 = vunpack.i.l.bf16 %v1573_v43  ;;  %1416 = vmatprep.subr.msk.bf16.mxu1 %vm1806_vm10, %v1415_v45  ;;  %v1424_v49 = vpack.c.bf16 %v1019_v51, %v1011_v56  ;;  %vm2214_vm10 = vmmov %vm2212_vm4 }
 0x340   : > { %v1002_v58 = vsel %vm2211_vm6, %v1579_v52, %v1580_v50  ;;  %v1003_v54 = vsel %vm2213_vm0, %v1580_v50, %v1579_v52 }
 0x341   : > { %v994_v59 = vsel %vm2212_vm4, %v1574_v55, %v1575_v53  ;;  %v995_v47 = vsel %vm2214_vm10, %v1575_v53, %v1574_v55 }
 0x342   : > { %1419 = vmatpush1.bf16.msk.msra.mxu1 %vm1827_vm2, %v1418_v41  ;;  %v1427_v61 = vpack.c.bf16 %v1002_v58, %v994_v59  ;;  %v1430_v60 = vpack.c.bf16 %v1003_v54, %v995_v47  ;;  %vm2215_vm2 = vcmask 588800  }
 0x343   : > { %1422 = vmatprep.subr.msk.bf16.mxu1 %vm1844_vm8, %v1421_v57 }
 0x346   : > { %1425 = vmatpush1.bf16.msk.msra.mxu1 %vm1856_vm14, %v1424_v49  ;;  %vm2218_vm14 = vcmask 64512  }
 0x347   : > { %1428 = vmatprep.subr.msk.bf16.mxu1 %vm1869_vm1, %v1427_v61  ;;  %vm2221_vm3 = vmmov %vm2218_vm14 }
 0x34a   : > { %1431 = vmatpush1.bf16.msk.msra.mxu1 %vm1883_vm7, %v1430_v60  ;;  %vm2216_vm7 = vcmask 1043456   ;;  %v743_v18 = vpop.permute.xlu0 %742 }
 0x34b   : > { %v1069_v1 = vpop.permute.xlu1 %1068  ;;  %vm2217_vm8 = vmmov %vm2216_vm7  ;;  %v790_v22 = vadd.f32 %v1983_v38, %v743_v18  ;;  %v792_v27 = vadd.f32 %v1985_v39, %v743_v18  ;;  %v1188_v39 = vld [vmem:[%s2127_s13] sm:$0x3] }
 0x34c   : > { %vm2219_vm1 = vmmov %vm2216_vm7 }
 0x34d   : > { %1432 = vmatmul.mubr.msk.bf16.vlgmr.msra.gmra.mxu1 %vm2215_vm2, %v1064_v7  ;;  %vm2220_vm15 = vmmov %vm2219_vm1 }
 0x34e   : > { %v1130_v24 = vpop.permute.xlu0 %1129 }
 0x34f   : > { %v936_v19 = vpop.permute.xlu1 %935 }
 0x353   : > { %v1193_v40 = vpop.permute.xlu1 %1192 }
 0x383   : > { %v981_v6 = vpop.f32.mrf.mxu0 }
 0x384   : > { %v982_v20 = vadd.f32 %v981_v6, %v936_v19 }
 0x385   : > { %v983_v62 = vpop.f32.mrf.mxu0 }
 0x386   : > { %v984_v23 = vadd.f32 %v983_v62, %v936_v19  ;;  %v988_v28 = vadd.f32 %v982_v20, %v790_v22 }
 0x387   : > { %v985_v63 = vpop.f32.mrf.mxu0 }
 0x388   : > { %v989_v29 = vadd.f32 %v984_v23, %v792_v27 }
 0x389   : > { %v986_v0 = vpop.f32.mrf.mxu0 }
 0x40d   : > { %v1114_v11 = vpop.f32.mrf.mxu1 }
 0x40e   : > { %v1115_v2 = vadd.f32 %v1114_v11, %v1069_v1 }
 0x40f   : > { %v1116_v17 = vpop.f32.mrf.mxu1 }
 0x410   : > { %v1121_v16 = vmax.f32 %v1115_v2, 0.0  ;;  %v1117_v4 = vadd.f32 %v1116_v17, %v1069_v1 }
 0x411   : > { %v1118_v5 = vpop.f32.mrf.mxu1 }
 0x412   : > { %v1124_v8 = vpack.c.bf16 %v1121_v16, %v1121_v16  ;;  %1245 = vst [vmem:[%s529_s24] sm:$0xff] %v1121_v16  ;;  %v1122_v9 = vmax.f32 %v1117_v4, 0.0 }
 0x413   : > { %v1119_v10 = vpop.f32.mrf.mxu1 }
 0x414   : > { %v1125_v12 = vpack.c.bf16 %v1122_v9, %v1122_v9  ;;  %1246 = vst [vmem:[%s529_s24 + $0x8] sm:$0xff] %v1122_v9  ;;  %v1136_v13 = vsel %vm2217_vm8, %v1124_v8, 0 }
 0x416   : > { %1433 = vmatprep.subr.msk.bf16.mxu0 %vm2216_vm7, %v1125_v12 }
 0x417   : > { %1156 = vmatpush1.bf16.msra.mxu0 %v1136_v13 }
 0x41a   : > { %1434 = vmatmul.mubr.msk.bf16.vlgmr.msra.gmra.mxu0 %vm2218_vm14, %v1123_v14 }
 0x41b   : > { %1236 = vmatprep.mubr.bf16.mxu0 %v1596_v3 }
 0x4da   : > { %v1175_v26 = vpop.f32.mrf.mxu0 }
 0x4db   : > { %v1176_v25 = vadd.f32 %v1175_v26, %v1130_v24 }
 0x4dc   : > { %v1177_v21 = vpop.f32.mrf.mxu0 }
 0x4dd   : > { %v1182_v15 = vadd.f32 %v1176_v25, %v988_v28  ;;  %v1178_v30 = vadd.f32 %v1177_v21, %v1130_v24 }
 0x4de   : > { %v1179_v31 = vpop.f32.mrf.mxu0 }
 0x4df   : > { %v1184_v32 = vmax.f32 %v1182_v15, 0.0  ;;  %v1183_v3 = vadd.f32 %v1178_v30, %v989_v29 }
 0x4e0   : > { %v1180_v33 = vpop.f32.mrf.mxu0 }
 0x4e1   : > { %v1186_v34 = vpack.c.bf16 %v1184_v32, %v1184_v32  ;;  %v1185_v35 = vmax.f32 %v1183_v3, 0.0 }
 0x4e3   : > { %v1187_v36 = vpack.c.bf16 %v1185_v35, %v1185_v35  ;;  %v1199_v38 = vsel %vm2220_vm15, %v1186_v34, 0 }
 0x4e5   : > { %1435 = vmatprep.subr.msk.bf16.mxu0 %vm2219_vm1, %v1187_v36 }
 0x4e6   : > { %1219 = vmatpush1.bf16.msra.mxu0 %v1199_v38 }
 0x4e9   : > { %1436 = vmatmul.mubr.msk.bf16.vlgmr.msra.gmra.mxu0 %vm2221_vm3, %v1188_v39 }
 0x5a9   : > { %v1238_v37 = vpop.f32.mrf.mxu0 }
 0x5aa   : > { %v1239_v43 = vadd.f32 %v1238_v37, %v1193_v40 }
 0x5ab   : > { %v1240_v42 = vpop.f32.mrf.mxu0 }
 0x5ac   : > { %v1241_v44 = vadd.f32 %v1240_v42, %v1193_v40 }
 0x5ad   : > { %v1242_v45 = vpop.f32.mrf.mxu0 }
 0x5ae   : > { %v1249_v46 = vcombine.low %v1239_v43, %v1241_v44 }
 0x5af   : > { %v1243_v48 = vpop.f32.mrf.mxu0 }
 0x5b0   : > { %1251 = vst [vmem:[%s534_s20] sm:$0xff] %v1249_v46 }
 0x5b1 PF: > { %s27_s21 = sadd.s32 1, %s1588_s21  }
 0x5b2   : > { %p24_p4 = scmp.ge.s32.totalorder %s27_s21, 4  }
 0x5b4   :  { %26 = sbr.rel (!%p24_p4) target bundleno = 2 (0x2), region = 122 }

</bundles_post_ra>
